<compile_context>
chip_gen: v6e
topology: v6e:2x2x1
jax: 0.10.0
libtpu: 0.0.40
codegen_flags: <defaults>
</compile_context>

<pallas_src>
import math
import functools

import jax
import jax.numpy as jnp
from jax.experimental import pallas as pl
from jax.experimental.pallas import tpu as pltpu


def _round_up(v, mult):
    return ((v + mult - 1) // mult) * mult


def _choose_tiles(B, D, C, bytes_per_el):
    """Largest (TB, TC) whose double-buffered tiles fit a ~20 MiB VMEM budget."""
    TB = min(_round_up(B, 8), 128)
    budget = 20 * 1024 * 1024

    def vmem_bytes(tc):
        w_tile = tc * D * bytes_per_el * 2            # weight tile, double buffered
        x_tile = TB * D * bytes_per_el * 2            # activation tile
        o_tile = TB * tc * 4 * 2                      # f32 output tile
        vecs = (tc * 4 + tc * 4 + TB * 4 + TB * 4) * 2  # bias, 1/||w||, 1/||x||, label
        return w_tile + x_tile + o_tile + vecs

    tc = min(_round_up(C, 128), 4096)
    while tc > 128 and vmem_bytes(tc) > budget:
        tc -= 128
    return TB, max(tc, 128)


def _arcmargin_kernel(x_ref, w_ref, b_ref, inv_x_ref, inv_w_ref, label_ref, out_ref,
                      *, s, cos_m, sin_m, th, mm, easy_margin, tile_c):
    x = x_ref[...]              # (TB, D)
    w = w_ref[...]              # (TC, D)  nn.Linear weight tile (row-major)
    b = b_ref[...]              # (1, TC)  f32
    inv_x = inv_x_ref[...]      # (TB, 1)  f32, 1/||x||
    inv_w = inv_w_ref[...]      # (1, TC)  f32, 1/||w_c||
    labels = label_ref[...]     # (TB, 1)  int32

    # linear(X) = X @ W.T + b on the MXU; the RHS transpose folds into the
    # weight load, so the (C, D) weight never needs an HBM transpose.
    logits = jnp.dot(x, w.T, preferred_element_type=jnp.float32) + b      # (TB, TC) f32

    # cosine = logits / (||x|| * ||w||)  ->  multiply by precomputed reciprocals.
    cosine = logits * inv_x * inv_w                                       # (TB, TC)

    # One-hot of the label, offset by this C-tile's global column base.
    col = tile_c * pl.program_id(1) + jax.lax.broadcasted_iota(jnp.int32, cosine.shape, 1)
    one_hot = col == labels                                               # (TB, TC) bool

    # Margin math only on the label column: every other output column is plain
    # `cosine`, so the reference's full-matrix sqrt is redundant work.
    cos_lab = jnp.sum(jnp.where(one_hot, cosine, 0.0), axis=1, keepdims=True)  # (TB, 1)
    sin_lab = jnp.sqrt(1.0 - cos_lab * cos_lab)    # NaN if |cos|>1, same as torch.sqrt
    phi = cos_lab * cos_m - sin_lab * sin_m
    if easy_margin:
        phi = jnp.where(cos_lab > 0.0, phi, cos_lab)
    else:
        phi = jnp.where(cos_lab > th, phi, cos_lab - mm)

    out_ref[...] = jnp.where(one_hot, phi, cosine) * s


def arc_margin_product(x, weight, bias, label, *, s=30.0, m=0.4,
                       easy_margin=False, matmul_dtype=jnp.float32):
    """x: (B, D), weight: (C, D) (nn.Linear layout), bias: (C,), label: (B,) int.

    matmul_dtype=jnp.bfloat16 halves the HBM weight traffic (recommended on
    v5e/v6e when exact-f32 parity is not required); the epilogue stays in f32.
    """
    x = x.astype(jnp.float32)
    weight = weight.astype(jnp.float32)
    B, D = x.shape
    C = weight.shape[0]

    TB, TC = _choose_tiles(B, D, C, jnp.dtype(matmul_dtype).itemsize)
    grid = (pl.cdiv(B, TB), pl.cdiv(C, TC))

    # Hoist the norm reductions out of the grid loop; rsqrt turns the in-kernel
    # per-element divide into two broadcast multiplies.
    inv_x = jax.lax.rsqrt(jnp.sum(x * x, axis=1, keepdims=True) + 1e-12)                 # (B, 1)
    inv_w = jax.lax.rsqrt(jnp.sum(weight * weight, axis=1, keepdims=True) + 1e-12)
    inv_w = inv_w.reshape(1, C)                                                          # (1, C)
    b2 = bias.reshape(1, C).astype(jnp.float32)
    label2 = label.reshape(B, 1).astype(jnp.int32)

    kernel = functools.partial(
        _arcmargin_kernel,
        s=float(s),
        cos_m=math.cos(m),
        sin_m=math.sin(m),
        th=math.cos(math.pi - m),
        mm=math.sin(math.pi - m) * m,
        easy_margin=bool(easy_margin),
        tile_c=TC,
    )

    return pl.pallas_call(
        kernel,
        out_shape=jax.ShapeDtypeStruct((B, C), jnp.float32),
        grid_spec=pltpu.PrefetchScalarGridSpec(
            num_scalar_prefetch=0,
            grid=grid,
            in_specs=[
                pl.BlockSpec((TB, D), lambda i, j: (i, 0)),   # x
                pl.BlockSpec((TC, D), lambda i, j: (j, 0)),   # weight (native layout)
                pl.BlockSpec((1, TC), lambda i, j: (0, j)),   # bias
                pl.BlockSpec((TB, 1), lambda i, j: (i, 0)),   # 1/||x||
                pl.BlockSpec((1, TC), lambda i, j: (0, j)),   # 1/||w||
                pl.BlockSpec((TB, 1), lambda i, j: (i, 0)),   # label
            ],
            out_specs=pl.BlockSpec((TB, TC), lambda i, j: (i, j)),
        ),
        compiler_params=pltpu.CompilerParams(
            dimension_semantics=("parallel", "parallel"),   # megacore split on v7x
            vmem_limit_bytes=32 * 1024 * 1024,
        ),
    )(x.astype(matmul_dtype), weight.astype(matmul_dtype), b2, inv_x, inv_w, label2)


def _reference(x, weight, bias, label, *, s=30.0, m=0.4, easy_margin=False):
    cos_m, sin_m = math.cos(m), math.sin(m)
    th, mm = math.cos(math.pi - m), math.sin(math.pi - m) * m
    logits = x @ weight.T + bias
    x_norm = jnp.sqrt(jnp.sum(x * x, axis=1, keepdims=True) + 1e-12)
    w_norm = jnp.sqrt(jnp.sum(weight * weight, axis=1, keepdims=True) + 1e-12).reshape(1, -1)
    cosine = logits / (x_norm * w_norm)
    sine = jnp.sqrt(1.0 - cosine * cosine)
    phi = cosine * cos_m - sine * sin_m
    if easy_margin:
        phi = jnp.where(cosine > 0.0, phi, cosine)
    else:
        phi = jnp.where(cosine > th, phi, cosine - mm)
    one_hot = jax.nn.one_hot(label, weight.shape[0], dtype=jnp.int32)
    return jnp.where(one_hot == 1, phi, cosine) * s


if __name__ == "__main__":
    key = jax.random.PRNGKey(0)
    k_x, k_w, k_b, k_l = jax.random.split(key, 4)

    B, in_features, out_features = 8, 32, 128

    x = jax.random.normal(k_x, (B, in_features), dtype=jnp.float32)
    # deterministic nn.Linear-style init: U(-1/sqrt(in), 1/sqrt(in))
    bound = 1.0 / math.sqrt(in_features)
    weight = jax.random.uniform(k_w, (out_features, in_features),
                                minval=-bound, maxval=bound, dtype=jnp.float32)
    bias = jax.random.uniform(k_b, (out_features,),
                              minval=-bound, maxval=bound, dtype=jnp.float32)
    label = jax.random.randint(k_l, (B,), 0, out_features, dtype=jnp.int32)

    out = arc_margin_product(x, weight, bias, label, s=30.0, m=0.4, easy_margin=False)
    out = jax.block_until_ready(out)

    ref = _reference(x, weight, bias, label, s=30.0, m=0.4, easy_margin=False)
    assert out.shape == (B, out_features)
    assert jnp.allclose(out, ref, atol=1e-4, rtol=1e-4), "mismatch vs JAX reference"

    print("KERNEL_OK")
</pallas_src>

<mosaic_0001>
module attributes {stable_mosaic.version = 11 : i64} {
  func.func @_arcmargin_kernel(%arg0: i32, %arg1: i32, %arg2: memref<8x32xf32, #tpu.memory_space<vmem>>, %arg3: memref<128x32xf32, #tpu.memory_space<vmem>>, %arg4: memref<1x128xf32, #tpu.memory_space<vmem>>, %arg5: memref<8x1xf32, #tpu.memory_space<vmem>>, %arg6: memref<1x128xf32, #tpu.memory_space<vmem>>, %arg7: memref<8x1xi32, #tpu.memory_space<vmem>>, %arg8: memref<8x128xf32, #tpu.memory_space<vmem>>) attributes {dimension_semantics = [#tpu.dimension_semantics<parallel>, #tpu.dimension_semantics<parallel>], iteration_bounds = array<i64: 1, 1>, scalar_prefetch = 0 : i64, scratch_operands = 0 : i64, tpu.core_type = #tpu.core_type<tc>, window_params = [{transform_indices = @transform_0, window_bounds = array<i64: 8, 32>}, {transform_indices = @transform_1, window_bounds = array<i64: 128, 32>}, {transform_indices = @transform_2, window_bounds = array<i64: 1, 128>}, {transform_indices = @transform_3, window_bounds = array<i64: 8, 1>}, {transform_indices = @transform_4, window_bounds = array<i64: 1, 128>}, {transform_indices = @transform_5, window_bounds = array<i64: 8, 1>}, {transform_indices = @transform_6, window_bounds = array<i64: 8, 128>}]} {
    %c0 = arith.constant 0 : index
    %c0_0 = arith.constant 0 : index
    %0 = vector.load %arg2[%c0, %c0_0] : memref<8x32xf32, #tpu.memory_space<vmem>>, vector<8x32xf32>
    %c0_1 = arith.constant 0 : index
    %c0_2 = arith.constant 0 : index
    %1 = vector.load %arg3[%c0_1, %c0_2] : memref<128x32xf32, #tpu.memory_space<vmem>>, vector<128x32xf32>
    %c0_3 = arith.constant 0 : index
    %c0_4 = arith.constant 0 : index
    %2 = vector.load %arg4[%c0_3, %c0_4] : memref<1x128xf32, #tpu.memory_space<vmem>>, vector<1x128xf32>
    %c0_5 = arith.constant 0 : index
    %c0_6 = arith.constant 0 : index
    %3 = vector.load %arg5[%c0_5, %c0_6] : memref<8x1xf32, #tpu.memory_space<vmem>>, vector<8x1xf32>
    %c0_7 = arith.constant 0 : index
    %c0_8 = arith.constant 0 : index
    %4 = vector.load %arg6[%c0_7, %c0_8] : memref<1x128xf32, #tpu.memory_space<vmem>>, vector<1x128xf32>
    %c0_9 = arith.constant 0 : index
    %c0_10 = arith.constant 0 : index
    %5 = vector.load %arg7[%c0_9, %c0_10] : memref<8x1xi32, #tpu.memory_space<vmem>>, vector<8x1xi32>
    %6 = tpu.transpose %1, [1, 0] : vector<128x32xf32> -> vector<32x128xf32>
    %cst = arith.constant dense<0.000000e+00> : vector<8x128xf32>
    %7 = tpu.matmul %0, %6, %cst {dimension_numbers = #tpu.dot_dimension_numbers<[1], [0], [0], [1], [0, 0, 1, 1], [], []>} : vector<8x32xf32>, vector<32x128xf32>, vector<8x128xf32> -> vector<8x128xf32>
    %8 = vector.broadcast %2 : vector<1x128xf32> to vector<8x128xf32>
    %9 = arith.addf %7, %8 : vector<8x128xf32>
    %10 = vector.broadcast %3 : vector<8x1xf32> to vector<8x128xf32>
    %11 = arith.mulf %9, %10 : vector<8x128xf32>
    %12 = vector.broadcast %4 : vector<1x128xf32> to vector<8x128xf32>
    %13 = arith.mulf %11, %12 : vector<8x128xf32>
    %c128_i32 = arith.constant 128 : i32
    %14 = arith.muli %c128_i32, %arg1 : i32
    %15 = tpu.iota {dimensions = array<i32: 1>} : vector<8x128xi32>
    %16 = vector.broadcast %14 : i32 to vector<8x128xi32>
    %17 = arith.addi %16, %15 : vector<8x128xi32>
    %18 = vector.broadcast %5 : vector<8x1xi32> to vector<8x128xi32>
    %19 = arith.cmpi eq, %17, %18 : vector<8x128xi32>
    %cst_11 = arith.constant 0.000000e+00 : f32
    %20 = vector.broadcast %cst_11 : f32 to vector<8x128xf32>
    %21 = arith.select %19, %13, %20 : vector<8x128xi1>, vector<8x128xf32>
    %cst_12 = arith.constant dense<0.000000e+00> : vector<8xf32>
    %22 = vector.multi_reduction <add>, %21, %cst_12 [1] : vector<8x128xf32> to vector<8xf32>
    %23 = vector.shape_cast %22 : vector<8xf32> to vector<8x1xf32>
    %24 = arith.mulf %23, %23 : vector<8x1xf32>
    %cst_13 = arith.constant 1.000000e+00 : f32
    %25 = vector.broadcast %cst_13 : f32 to vector<8x1xf32>
    %26 = arith.subf %25, %24 : vector<8x1xf32>
    %27 = math.sqrt %26 : vector<8x1xf32>
    %cst_14 = arith.constant 0.921060979 : f32
    %28 = vector.broadcast %cst_14 : f32 to vector<8x1xf32>
    %29 = arith.mulf %23, %28 : vector<8x1xf32>
    %cst_15 = arith.constant 0.389418334 : f32
    %30 = vector.broadcast %cst_15 : f32 to vector<8x1xf32>
    %31 = arith.mulf %27, %30 : vector<8x1xf32>
    %32 = arith.subf %29, %31 : vector<8x1xf32>
    %cst_16 = arith.constant -0.921060979 : f32
    %33 = vector.broadcast %cst_16 : f32 to vector<8x1xf32>
    %34 = arith.cmpf ogt, %23, %33 : vector<8x1xf32>
    %cst_17 = arith.constant 0.155767336 : f32
    %35 = vector.broadcast %cst_17 : f32 to vector<8x1xf32>
    %36 = arith.subf %23, %35 : vector<8x1xf32>
    %37 = arith.select %34, %32, %36 : vector<8x1xi1>, vector<8x1xf32>
    %38 = vector.shape_cast %37 : vector<8x1xf32> to vector<8x1xf32>
    %39 = vector.broadcast %38 : vector<8x1xf32> to vector<8x128xf32>
    %40 = arith.select %19, %39, %13 : vector<8x128xi1>, vector<8x128xf32>
    %cst_18 = arith.constant 3.000000e+01 : f32
    %41 = vector.broadcast %cst_18 : f32 to vector<8x128xf32>
    %42 = arith.mulf %40, %41 : vector<8x128xf32>
    %c0_19 = arith.constant 0 : index
    %c0_20 = arith.constant 0 : index
    %43 = vector.load %arg8[%c0_19, %c0_20] : memref<8x128xf32, #tpu.memory_space<vmem>>, vector<8x128xf32>
    tpu.vector_store %arg8[%c0_19, %c0_20], %42 {strides = array<i32>} : memref<8x128xf32, #tpu.memory_space<vmem>>, vector<8x128xf32>,
    return
  }
  func.func @transform_0(%arg0: i32, %arg1: i32) -> (i32, i32) {
    %c0_i32 = arith.constant 0 : i32
    %c0_i32_0 = arith.constant 0 : i32
    return %arg0, %c0_i32 : i32, i32
  }
  func.func @transform_1(%arg0: i32, %arg1: i32) -> (i32, i32) {
    %c0_i32 = arith.constant 0 : i32
    %c0_i32_0 = arith.constant 0 : i32
    return %arg1, %c0_i32 : i32, i32
  }
  func.func @transform_2(%arg0: i32, %arg1: i32) -> (i32, i32) {
    %c0_i32 = arith.constant 0 : i32
    %c0_i32_0 = arith.constant 0 : i32
    return %c0_i32, %arg1 : i32, i32
  }
  func.func @transform_3(%arg0: i32, %arg1: i32) -> (i32, i32) {
    %c0_i32 = arith.constant 0 : i32
    %c0_i32_0 = arith.constant 0 : i32
    return %arg0, %c0_i32 : i32, i32
  }
  func.func @transform_4(%arg0: i32, %arg1: i32) -> (i32, i32) {
    %c0_i32 = arith.constant 0 : i32
    %c0_i32_0 = arith.constant 0 : i32
    return %c0_i32, %arg1 : i32, i32
  }
  func.func @transform_5(%arg0: i32, %arg1: i32) -> (i32, i32) {
    %c0_i32 = arith.constant 0 : i32
    %c0_i32_0 = arith.constant 0 : i32
    return %arg0, %c0_i32 : i32, i32
  }
  func.func @transform_6(%arg0: i32, %arg1: i32) -> (i32, i32) {
    %c0_i32 = arith.constant 0 : i32
    return %arg0, %arg1 : i32, i32
  }
}

</mosaic_0001>

<bundles_post_ra>
// kernel: tpu_custom_call.1
= control target key start
LH: loop header
LB: loop body
LE: loop exit
PB: predicated region body
PF: predicated region fallthrough
CT: control target
= control target key end

     0   :  { %vm51_vm0 = vcmask 261120   ;;  %v331_v1 = vmov 0.0   ;;  %vm332_vm1 = vmmov 0   ;;  %v333_v2 = vmov 0   ;;  %s455_s0 = inlined_call_operand.vmem [shape: f32[8,32], index: 0, kind: input, shape index: {}]   ;;  %s456_s1 = inlined_call_operand.vmem [shape: f32[128,32], index: 1, kind: input, shape index: {}]   ;;  %s457_s2 = inlined_call_operand.vmem [shape: f32[1,128], index: 2, kind: input, shape index: {}]   ;;  %s458_s3 = inlined_call_operand.vmem [shape: f32[8,1], index: 3, kind: input, shape index: {}]   ;;  %s459_s4 = inlined_call_operand.vmem [shape: f32[1,128], index: 4, kind: input, shape index: {}]   ;;  %s460_s5 = inlined_call_operand.vmem [shape: s32[8,1], index: 5, kind: input, shape index: {}]   ;;  %s461_s6 = inlined_call_operand.hbm [shape: f32[8,128], index: 6, kind: output, shape index: {}]  }
   0x1   :  { %v40_v0 = vld [vmem:[%s456_s1 + $0x78] sm:$0xff]  ;;  %267 = vmatprep.subr.mxu0 %v331_v1  ;;  %299 = vmatprep.mubr.msk.f32.mxu0 %vm332_vm1, %v331_v1  ;;  %v39_v3 = vld [vmem:[%s456_s1 + $0x70] sm:$0xff]  ;;  %v42_v4 = vld [vmem:[%s458_s3] sm:$0xff] }
   0x2   :  { %268 = vmatpush3.xpose.msk.msra.mxu0 %vm51_vm0, %v40_v0  ;;  %306 = vset.pattern.permute.xlu0 %v333_v2 }
   0x3   :  { %269 = vmatprep.subr.mxu0 %v331_v1  ;;  %175 = vperm.xlu0 %306, %v42_v4  }
   0x6   :  { %270 = vmatpush3.xpose.msk.msra.mxu0 %vm51_vm0, %v39_v3 }
   0x7   :  { %11 = vsyncpa [#allocation3], 0  ;;  %271 = vmatprep.subr.mxu0 %v331_v1  ;;  %v38_v5 = vld [vmem:[%s456_s1 + $0x68] sm:$0xff]  ;;  %v44_v6 = vld [vmem:[%s460_s5] sm:$0xff]  ;;  %v187_v23 = vlaneseq }
   0x8   :  { %192 = vperm.xlu0 %306, %v44_v6   ;;  %v37_v7 = vld [vmem:[%s456_s1 + $0x60] sm:$0xff]  ;;  %v36_v8 = vld [vmem:[%s456_s1 + $0x58] sm:$0xff]  ;;  %v35_v9 = vld [vmem:[%s456_s1 + $0x50] sm:$0xff] }
   0x9   :  { %v34_v10 = vld [vmem:[%s456_s1 + $0x48] sm:$0xff]  ;;  %v33_v11 = vld [vmem:[%s456_s1 + $0x40] sm:$0xff]  ;;  %v32_v12 = vld [vmem:[%s456_s1 + $0x38] sm:$0xff]  ;;  %v188_v26 = vand.u32 127, %v187_v23 }
   0xa   :  { %272 = vmatpush3.xpose.msk.msra.mxu0 %vm51_vm0, %v38_v5  ;;  %v31_v13 = vld [vmem:[%s456_s1 + $0x30] sm:$0xff]  ;;  %v30_v14 = vld [vmem:[%s456_s1 + $0x28] sm:$0xff]  ;;  %v29_v15 = vld [vmem:[%s456_s1 + $0x20] sm:$0xff] }
   0xb   :  { %273 = vmatprep.subr.mxu0 %v331_v1  ;;  %v28_v16 = vld [vmem:[%s456_s1 + $0x18] sm:$0xff]  ;;  %v27_v17 = vld [vmem:[%s456_s1 + $0x10] sm:$0xff]  ;;  %v26_v18 = vld [vmem:[%s456_s1 + $0x8] sm:$0xff] }
   0xc   :  { %v25_v19 = vld [vmem:[%s456_s1] sm:$0xff] }
   0xd   :  { %v24_v20 = vld [vmem:[%s455_s0] sm:$0xff]  ;;  %s334_s0 = smov [#allocation2]  }
   0xe   :  { %274 = vmatpush3.xpose.msk.msra.mxu0 %vm51_vm0, %v37_v7  ;;  %v230_v22 = vld [vmem:[%s457_s2] ss:$0 sm:$0xff]  ;;  %s222_s2 = sshll.u32 %s334_s0, 4  ;;  %s223_s2 = int_to_ptr.vmem [resolvable:$true] %s222_s2 }
   0xf   :  { %275 = vmatprep.subr.mxu0 %v331_v1  ;;  %v248_v28 = vld [vmem:[%s459_s4] ss:$0 sm:$0xff]  ;;  %s309_s4 = scalar_lea.vmem %s223_s2, 128  ;;  %p314_p1 = scmp.lt.s32.totalorder %s223_s2, %s223_s2 }
  0x10   :  { %p310_p0 = scmp.ne.s32.totalorder %s223_s2, %s309_s4  ;;  %p315_p2 = scmp.lt.s32.totalorder %s309_s4, %s309_s4 }
  0x12   :  { %276 = vmatpush3.xpose.msk.msra.mxu0 %vm51_vm0, %v36_v8  ;;  %p316_p3 = por %p315_p2, %p314_p1 }
  0x13   :  { %277 = vmatprep.subr.mxu0 %v331_v1 }
  0x14   :  { %p317_p4 = pnand %p316_p3, %p310_p0 }
  0x16   :  { %278 = vmatpush3.xpose.msk.msra.mxu0 %vm51_vm0, %v35_v9 }
  0x17   :  { %279 = vmatprep.subr.mxu0 %v331_v1 }
  0x1a   :  { %280 = vmatpush3.xpose.msk.msra.mxu0 %vm51_vm0, %v34_v10 }
  0x1b   :  { %281 = vmatprep.subr.mxu0 %v331_v1 }
  0x1e   :  { %282 = vmatpush3.xpose.msk.msra.mxu0 %vm51_vm0, %v33_v11 }
  0x1f   :  { %283 = vmatprep.subr.mxu0 %v331_v1 }
  0x22   :  { %284 = vmatpush3.xpose.msk.msra.mxu0 %vm51_vm0, %v32_v12 }
  0x23   :  { %285 = vmatprep.subr.mxu0 %v331_v1 }
  0x26   :  { %286 = vmatpush3.xpose.msk.msra.mxu0 %vm51_vm0, %v31_v13 }
  0x27   :  { %287 = vmatprep.subr.mxu0 %v331_v1 }
  0x2a   :  { %288 = vmatpush3.xpose.msk.msra.mxu0 %vm51_vm0, %v30_v14 }
  0x2b   :  { %289 = vmatprep.subr.mxu0 %v331_v1 }
  0x2e   :  { %290 = vmatpush3.xpose.msk.msra.mxu0 %vm51_vm0, %v29_v15 }
  0x2f   :  { %291 = vmatprep.subr.mxu0 %v331_v1 }
  0x32   :  { %292 = vmatpush3.xpose.msk.msra.mxu0 %vm51_vm0, %v28_v16 }
  0x33   :  { %293 = vmatprep.subr.mxu0 %v331_v1 }
  0x36   :  { %294 = vmatpush3.xpose.msk.msra.mxu0 %vm51_vm0, %v27_v17 }
  0x37   :  { %295 = vmatprep.subr.mxu0 %v331_v1 }
  0x3a   :  { %296 = vmatpush3.xpose.msk.msra.mxu0 %vm51_vm0, %v26_v18 }
  0x3b   :  { %297 = vmatprep.subr.mxu0 %v331_v1 }
  0x3e   :  { %298 = vmatpush3.xpose.msk.msra.mxu0 %vm51_vm0, %v25_v19 }
  0x41   :  { %300 = vmatmul.mubr.msk.f32.vlgmr.msra.gmra.mxu0 %vm51_vm0, %v24_v20 }
  0x7e   :  { %v176_v21 = vpop.permute.xlu0 %175 }
  0x83   :  { %v193_v30 = vpop.permute.xlu0 %192 }
  0x84   :  { %vm194_vm2 = vcmp.eq.s32.totalorder %v188_v26, %v193_v30 }
 0x101   :  { %v169_v24 = vpop.f32.mrf.mxu0 }
 0x102   :  { %v170_v25 = vadd.f32 %v230_v22, %v169_v24 }
 0x103   :  { %v301_v27 = vpop.f32.mrf.mxu0 }
 0x104   :  { %v178_v29 = vmul.f32 %v176_v21, %v170_v25 }
 0x106   :  { %v185_v31 = vmul.f32 %v248_v28, %v178_v29 }
 0x108   :  { %v195_v32 = vsel %vm194_vm2, %v185_v31, 0.0 }
 0x109   :  { %196 = vadd.xlane.f32.xlu1 %v195_v32 }
 0x192   :  { %v197_v33 = vpop.xlane.xlu1 %196 }
 0x193   :  { %v198_v34 = vmul.f32 %v197_v33, %v197_v33  ;;  %v207_v41 = vmul.f32 0.921061, %v197_v33  ;;  %v249_v44 = vadd.f32 -0.15576734, %v197_v33  ;;  %vm210_vm5 = vcmp.gt.f32.partialorder %v197_v33, -0.921061 }
 0x195   :  { %v199_v35 = vsub.f32 1.0, %v198_v34 }
 0x197   :  { %307 = vrsqrt.f32 %v199_v35  ;;  %vm202_vm3 = vcmp.eq.f32.partialorder %v199_v35, inf  ;;  %v205_v38 = vand.u32 2147483648, %v199_v35  ;;  %vm204_vm4 = vcmp.eq.f32.partialorder %v199_v35, 0.0 }
 0x1a4   :  { %v308_v36 = vpop.eup %307 }
 0x1a5   :  { %v201_v37 = vmul.f32 %v308_v36, %v199_v35 }
 0x1a7   :  { %v203_v39 = vsel %vm202_vm3, %v199_v35, %v201_v37 }
 0x1a8   :  { %v206_v40 = vsel %vm204_vm4, %v205_v38, %v203_v39 }
 0x1a9   :  { %v208_v42 = vmul.f32 0.38941833, %v206_v40 }
 0x1ab   :  { %v209_v43 = vsub.f32 %v207_v41, %v208_v42 }
 0x1ad   :  { %v212_v45 = vsel %vm210_vm5, %v209_v43, %v249_v44 }
 0x1ae   :  { %v213_v46 = vsel %vm194_vm2, %v212_v45, %v185_v31 }
 0x1af   :  { %v214_v47 = vmul.f32 30.0, %v213_v46 }
 0x1b1   :  { %215 = vst [vmem:[#allocation2] sm:$0xff] %v214_v47 }
 0x1b2   :  { %320 = shalt.err (!%p317_p4)
}
 0x1b3   :  { %225 = dma.vmem_to_hbm [thread:$0]  %s223_s2, 128, %s461_s6, [#allocation3]  }
 0x1b4   :  { %329 = dma.done.wait [#allocation3], 128  }
 0x1b5   :  { %330 = vsyncadd [#allocation3], 4294967168 }
 0x1b6   :  { %229 = vsyncpa [#allocation3], 1 }

</bundles_post_ra>
